<compile_context>
chip_gen: v6e
topology: v6e:2x2x1
jax: 0.10.0
libtpu: 0.0.40
codegen_flags: <defaults>
</compile_context>

<pallas_src>
import functools
import math

import jax
import jax.numpy as jnp
from jax.experimental import pallas as pl
from jax.experimental.pallas import tpu as pltpu


def _round_up(x, m):
    return (x + m - 1) // m * m


def _vmem_capacity_bytes():
    """Physical VMEM per TensorCore (generation aware), with a safe fallback."""
    try:
        return int(pltpu.get_tpu_info().vmem_capacity_bytes)
    except Exception:
        return 64 << 20  # conservative (v7x size); v5e/v6e actually have 128 MiB


def _fused_mlp_kernel(*refs, num_layers, activation, compute_dtype, act_dtype):
    """refs = (x_ref, w1_ref, b1_ref, ..., wN_ref, bN_ref, o_ref).

    One grid step pushes one batch tile through every layer; the hidden
    activation `h` never leaves the chip between layers.
    """
    x_ref = refs[0]
    o_ref = refs[-1]

    h = x_ref[...]
    for l in range(num_layers):
        w_ref = refs[1 + 2 * l]
        b_ref = refs[2 + 2 * l]
        # MXU matmul: operands in compute_dtype, f32 accumulation.
        y = jnp.dot(
            h.astype(compute_dtype),
            w_ref[...].astype(compute_dtype),
            preferred_element_type=jnp.float32,
        )
        # Bias add in f32, then the activation in act_dtype (bf16 on v6e/v7x
        # keeps the EUP stream short and h already in MXU operand dtype).
        y = (y + b_ref[...]).astype(act_dtype)
        if activation == "tanh":
            y = jnp.tanh(y)            # EUP
        elif activation == "relu":
            y = jnp.maximum(y, 0.0)    # VPU
        else:  # sigmoid
            y = jax.nn.sigmoid(y)      # EUP
        h = y
    o_ref[...] = h.astype(o_ref.dtype)


def fused_mlp(x, padded_params, out_dim, *, activation="tanh",
              compute_dtype=jnp.float32, act_dtype=None, out_dtype=None,
              tile_b_max=512):
    """Run the whole MLP in a single Pallas kernel.

    x:             (B, Din), any float dtype (f32 or bf16).
    padded_params: list of (W_p, b_p); W_p: (Din_p, Dout_p) zero-padded (stored
                   in compute_dtype), b_p: (1, Dout_p) f32 zero-padded.
    out_dim:       true (unpadded) output feature count.
    """
    B, Din = x.shape
    num_layers = len(padded_params)
    din_p = padded_params[0][0].shape[0]
    dout_p = padded_params[-1][0].shape[1]
    widest = max([din_p] + [w.shape[1] for w, _ in padded_params])

    if act_dtype is None:
        # bf16 activations use the bf16 EUP/VPU path on v6e/v7x; pass
        # act_dtype=jnp.float32 explicitly on v5e (no bf16 vector units).
        act_dtype = compute_dtype
    if out_dtype is None:
        out_dtype = compute_dtype  # HBM-facing output matches compute dtype

    def _nbytes(a):
        return a.size * a.dtype.itemsize

    param_bytes = sum(_nbytes(w) + _nbytes(b) for w, b in padded_params)
    x_item = x.dtype.itemsize
    out_item = jnp.dtype(out_dtype).itemsize

    # ---- Generation-aware VMEM budget & batch-tile size --------------------
    vmem_cap = int(0.85 * _vmem_capacity_bytes())  # leave compiler headroom
    headroom = 8 << 20
    # Per-batch-row VMEM bytes: double-buffered x-in + double-buffered out +
    # widest f32 intermediate (+ its compute-dtype copy).
    per_row = (2 * din_p * x_item + 2 * dout_p * out_item
               + widest * 4 + widest * jnp.dtype(compute_dtype).itemsize)
    avail = vmem_cap - param_bytes - headroom
    if avail < per_row * 8:
        # TODO(synk): resident weights exceed the VMEM budget; stream weights
        # with a K-reduction grid axis (emit_pipeline, Buffered(2-3) weight
        # blocks, f32 accumulator + pl.when init/finalize) instead of failing.
        raise NotImplementedError(
            f"padded MLP weights ({param_bytes / 2**20:.1f} MiB) do not fit the "
            f"VMEM budget ({vmem_cap / 2**20:.1f} MiB); weight streaming is not "
            "implemented yet.")
    tile_cap = max(8, min(tile_b_max, avail // per_row) // 8 * 8)

    b_aligned = _round_up(B, 8)
    if b_aligned <= tile_cap:
        # Whole batch fits in one tile.  Split it in two so v7x's second
        # TensorCore gets work (no-op on v5e/v6e) — but never introduce batch
        # padding, which would force an extra HBM copy of x.
        if B >= 16 and B % 16 == 0:
            tile_b, num_tiles, b_p = B // 2, 2, B
        else:
            tile_b, num_tiles, b_p = B, 1, B  # full-extent block: legal for any B
    else:
        tile_b = tile_cap
        num_tiles = pl.cdiv(B, tile_b)
        b_p = num_tiles * tile_b

    # Pad x only when actually required (feature dim to a lane multiple and/or
    # a ragged last batch tile).  Zero-padded weight rows keep padded input
    # lanes inert, so results are exact.
    if (b_p, din_p) != (B, Din):
        x_p = jnp.pad(x, ((0, b_p - B), (0, din_p - Din)))
    else:
        x_p = x

    flat_inputs = [x_p]
    for w_p, bias_p in padded_params:
        flat_inputs.append(w_p)
        flat_inputs.append(bias_p)
    out_spec = pl.BlockSpec((tile_b, dout_p), lambda i: (i, 0))

    def _in_specs(single_buffer_weights):
        specs = [pl.BlockSpec((tile_b, din_p), lambda i: (i, 0))]
        for w_p, bias_p in padded_params:
            kw = {}
            if single_buffer_weights:
                # Constant index_map -> VMEM-resident; one buffer is enough
                # (double-buffering resident weights is pure VMEM waste).
                kw["pipeline_mode"] = pl.Buffered(1)
            specs.append(pl.BlockSpec(w_p.shape, lambda i: (0, 0), **kw))
            specs.append(pl.BlockSpec(bias_p.shape, lambda i: (0, 0), **kw))
        return specs

    flops = 2 * b_p * sum(w.shape[0] * w.shape[1] for w, _ in padded_params)
    transcendentals = (0 if activation == "relu"
                       else b_p * sum(w.shape[1] for w, _ in padded_params))
    bytes_accessed = _nbytes(x_p) + param_bytes + b_p * dout_p * out_item

    kernel = functools.partial(
        _fused_mlp_kernel, num_layers=num_layers, activation=activation,
        compute_dtype=compute_dtype, act_dtype=act_dtype)

    def _run(single_buffer_weights):
        param_buf = 1 if single_buffer_weights else 2
        vmem_limit = param_buf * param_bytes + tile_b * per_row + headroom
        vmem_limit = int(min(max(vmem_limit, 32 << 20), vmem_cap))
        return pl.pallas_call(
            kernel,
            out_shape=jax.ShapeDtypeStruct((b_p, dout_p), out_dtype),
            grid_spec=pltpu.PrefetchScalarGridSpec(
                num_scalar_prefetch=0,
                grid=(num_tiles,),
                in_specs=_in_specs(single_buffer_weights),
                out_specs=out_spec,
            ),
            compiler_params=pltpu.CompilerParams(
                dimension_semantics=("parallel",),
                vmem_limit_bytes=vmem_limit,
            ),
            cost_estimate=pl.CostEstimate(
                flops=int(flops),
                transcendentals=int(transcendentals),
                bytes_accessed=int(bytes_accessed),
            ),
        )(*flat_inputs)

    if hasattr(pl, "Buffered"):
        try:
            out_p = _run(True)
        except Exception:
            # Buffered(1) not supported on this jax/Mosaic version -> default
            # (double-buffered) specs; correctness is unaffected.
            out_p = _run(False)
    else:
        out_p = _run(False)

    if (b_p, dout_p) == (B, out_dim):
        return out_p
    return out_p[:B, :out_dim]


class MLP:
    """JAX/Pallas port of the PyTorch MLP module (fused single-kernel forward)."""

    def __init__(self, input_dim, hidden_dims=(128, 128), activation="tanh",
                 key=None, compute_dtype=jnp.float32, act_dtype=None):
        assert activation in ("tanh", "relu", "sigmoid")
        self.activation = activation
        self.out_dim = hidden_dims[-1]
        self.compute_dtype = compute_dtype
        self.act_dtype = act_dtype
        if key is None:
            key = jax.random.PRNGKey(0)

        self.params = []         # unpadded (W_t, b) -- reference math / inspection
        self.padded_params = []  # lane/sublane padded params fed to the kernel
        last_dim = input_dim
        for nh in hidden_dims:
            key, kw, kb = jax.random.split(key, 3)
            # Deterministic init mimicking PyTorch nn.Linear default:
            # U(-1/sqrt(fan_in), 1/sqrt(fan_in)) for both weight and bias.
            bound = 1.0 / (last_dim ** 0.5)
            w = jax.random.uniform(kw, (nh, last_dim), jnp.float32, -bound, bound)
            b = jax.random.uniform(kb, (nh,), jnp.float32, -bound, bound)
            w_t = w.T  # (in, out)
            self.params.append((w_t, b))

            din_p = _round_up(last_dim, 128)
            dout_p = _round_up(nh, 128)
            w_p = jnp.zeros((din_p, dout_p), jnp.float32).at[:last_dim, :nh].set(w_t)
            b_p = jnp.zeros((1, dout_p), jnp.float32).at[:, :nh].set(b)
            if compute_dtype != jnp.float32:
                # Store weights in the MXU operand dtype (halves HBM/VMEM bytes).
                w_p = w_p.astype(compute_dtype)
            self.padded_params.append((w_p, b_p))
            last_dim = nh

    def __call__(self, x):
        return fused_mlp(
            x,
            self.padded_params,
            self.out_dim,
            activation=self.activation,
            compute_dtype=self.compute_dtype,
            act_dtype=self.act_dtype,
            out_dtype=self.compute_dtype,
        )


if __name__ == "__main__":
    key = jax.random.PRNGKey(0)
    k_in, k_model = jax.random.split(key)

    batch, input_dim = 16, 16
    hidden_dims = (32, 32)

    x = jax.random.normal(k_in, (batch, input_dim), jnp.float32)

    # f32 path (bit-safe default; exact vs. the pure-JAX reference).
    mlp = MLP(input_dim, hidden_dims=hidden_dims, activation="tanh", key=k_model)
    out = jax.block_until_ready(mlp(x))

    ref = x
    for w_t, b in mlp.params:
        ref = jnp.tanh(ref @ w_t + b)
    assert out.shape == (batch, hidden_dims[-1])
    assert out.dtype == jnp.float32
    assert jnp.allclose(out, ref, atol=1e-5, rtol=1e-5)

    # bf16 MXU-operands / bf16 HBM I/O / f32-accumulate path (v6e/v7x).
    # TODO(synk): on v5e pass act_dtype=jnp.float32 (no bf16 EUP/VPU there).
    mlp_bf16 = MLP(input_dim, hidden_dims=hidden_dims, activation="tanh",
                   key=k_model, compute_dtype=jnp.bfloat16)
    out_bf16 = jax.block_until_ready(mlp_bf16(x.astype(jnp.bfloat16)))
    assert out_bf16.shape == (batch, hidden_dims[-1])
    assert out_bf16.dtype == jnp.bfloat16
    assert jnp.allclose(out_bf16.astype(jnp.float32), ref, atol=5e-2, rtol=5e-2)

    print("KERNEL_OK")
</pallas_src>

<mosaic_0001>
module attributes {stable_mosaic.version = 11 : i64} {
  func.func @_fused_mlp_kernel(%arg0: i32, %arg1: memref<8x128xf32, #tpu.memory_space<vmem>>, %arg2: memref<128x128xf32, #tpu.memory_space<vmem>>, %arg3: memref<1x128xf32, #tpu.memory_space<vmem>>, %arg4: memref<128x128xf32, #tpu.memory_space<vmem>>, %arg5: memref<1x128xf32, #tpu.memory_space<vmem>>, %arg6: memref<8x128xf32, #tpu.memory_space<vmem>>) attributes {dimension_semantics = [#tpu.dimension_semantics<parallel>], iteration_bounds = array<i64: 2>, scalar_prefetch = 0 : i64, scratch_operands = 0 : i64, tpu.core_type = #tpu.core_type<tc>, window_params = [{transform_indices = @transform_0, window_bounds = array<i64: 8, 128>}, {pipeline_mode = #tpu.pipeline_mode<synchronous>, transform_indices = @transform_1, window_bounds = array<i64: 128, 128>}, {pipeline_mode = #tpu.pipeline_mode<synchronous>, transform_indices = @transform_2, window_bounds = array<i64: 1, 128>}, {pipeline_mode = #tpu.pipeline_mode<synchronous>, transform_indices = @transform_3, window_bounds = array<i64: 128, 128>}, {pipeline_mode = #tpu.pipeline_mode<synchronous>, transform_indices = @transform_4, window_bounds = array<i64: 1, 128>}, {transform_indices = @transform_5, window_bounds = array<i64: 8, 128>}]} {
    %c0 = arith.constant 0 : index
    %c0_0 = arith.constant 0 : index
    %0 = vector.load %arg1[%c0, %c0_0] : memref<8x128xf32, #tpu.memory_space<vmem>>, vector<8x128xf32>
    %c0_1 = arith.constant 0 : index
    %c0_2 = arith.constant 0 : index
    %1 = vector.load %arg2[%c0_1, %c0_2] : memref<128x128xf32, #tpu.memory_space<vmem>>, vector<128x128xf32>
    %cst = arith.constant dense<0.000000e+00> : vector<8x128xf32>
    %2 = tpu.matmul %0, %1, %cst {dimension_numbers = #tpu.dot_dimension_numbers<[1], [0], [0], [1], [0, 0, 1, 1], [], []>} : vector<8x128xf32>, vector<128x128xf32>, vector<8x128xf32> -> vector<8x128xf32>
    %c0_3 = arith.constant 0 : index
    %c0_4 = arith.constant 0 : index
    %3 = vector.load %arg3[%c0_3, %c0_4] : memref<1x128xf32, #tpu.memory_space<vmem>>, vector<1x128xf32>
    %4 = vector.broadcast %3 : vector<1x128xf32> to vector<8x128xf32>
    %5 = arith.addf %2, %4 : vector<8x128xf32>
    %6 = math.tanh %5 : vector<8x128xf32>
    %c0_5 = arith.constant 0 : index
    %c0_6 = arith.constant 0 : index
    %7 = vector.load %arg4[%c0_5, %c0_6] : memref<128x128xf32, #tpu.memory_space<vmem>>, vector<128x128xf32>
    %cst_7 = arith.constant dense<0.000000e+00> : vector<8x128xf32>
    %8 = tpu.matmul %6, %7, %cst_7 {dimension_numbers = #tpu.dot_dimension_numbers<[1], [0], [0], [1], [0, 0, 1, 1], [], []>} : vector<8x128xf32>, vector<128x128xf32>, vector<8x128xf32> -> vector<8x128xf32>
    %c0_8 = arith.constant 0 : index
    %c0_9 = arith.constant 0 : index
    %9 = vector.load %arg5[%c0_8, %c0_9] : memref<1x128xf32, #tpu.memory_space<vmem>>, vector<1x128xf32>
    %10 = vector.broadcast %9 : vector<1x128xf32> to vector<8x128xf32>
    %11 = arith.addf %8, %10 : vector<8x128xf32>
    %12 = math.tanh %11 : vector<8x128xf32>
    %c0_10 = arith.constant 0 : index
    %c0_11 = arith.constant 0 : index
    %13 = vector.load %arg6[%c0_10, %c0_11] : memref<8x128xf32, #tpu.memory_space<vmem>>, vector<8x128xf32>
    tpu.vector_store %arg6[%c0_10, %c0_11], %12 {strides = array<i32>} : memref<8x128xf32, #tpu.memory_space<vmem>>, vector<8x128xf32>,
    return
  }
  func.func @transform_0(%arg0: i32) -> (i32, i32) {
    %c0_i32 = arith.constant 0 : i32
    %c0_i32_0 = arith.constant 0 : i32
    return %arg0, %c0_i32 : i32, i32
  }
  func.func @transform_1(%arg0: i32) -> (i32, i32) {
    %c0_i32 = arith.constant 0 : i32
    %c0_i32_0 = arith.constant 0 : i32
    %c0_i32_1 = arith.constant 0 : i32
    return %c0_i32, %c0_i32_0 : i32, i32
  }
  func.func @transform_2(%arg0: i32) -> (i32, i32) {
    %c0_i32 = arith.constant 0 : i32
    %c0_i32_0 = arith.constant 0 : i32
    %c0_i32_1 = arith.constant 0 : i32
    return %c0_i32, %c0_i32_0 : i32, i32
  }
  func.func @transform_3(%arg0: i32) -> (i32, i32) {
    %c0_i32 = arith.constant 0 : i32
    %c0_i32_0 = arith.constant 0 : i32
    %c0_i32_1 = arith.constant 0 : i32
    return %c0_i32, %c0_i32_0 : i32, i32
  }
  func.func @transform_4(%arg0: i32) -> (i32, i32) {
    %c0_i32 = arith.constant 0 : i32
    %c0_i32_0 = arith.constant 0 : i32
    %c0_i32_1 = arith.constant 0 : i32
    return %c0_i32, %c0_i32_0 : i32, i32
  }
  func.func @transform_5(%arg0: i32) -> (i32, i32) {
    %c0_i32 = arith.constant 0 : i32
    %c0_i32_0 = arith.constant 0 : i32
    return %arg0, %c0_i32 : i32, i32
  }
}

module attributes {stable_mosaic.version = 11 : i64} {
  func.func @_fused_mlp_kernel(%arg0: i32, %arg1: memref<8x128xf32, #tpu.memory_space<vmem>>, %arg2: memref<128x128xf32, #tpu.memory_space<vmem>>, %arg3: memref<1x128xf32, #tpu.memory_space<vmem>>, %arg4: memref<128x128xf32, #tpu.memory_space<vmem>>, %arg5: memref<1x128xf32, #tpu.memory_space<vmem>>, %arg6: memref<8x128xf32, #tpu.memory_space<vmem>>) attributes {dimension_semantics = [#tpu.dimension_semantics<parallel>], iteration_bounds = array<i64: 2>, scalar_prefetch = 0 : i64, scratch_operands = 0 : i64, tpu.core_type = #tpu.core_type<tc>, window_params = [{transform_indices = @transform_0, window_bounds = array<i64: 8, 128>}, {pipeline_mode = #tpu.pipeline_mode<synchronous>, transform_indices = @transform_1, window_bounds = array<i64: 128, 128>}, {pipeline_mode = #tpu.pipeline_mode<synchronous>, transform_indices = @transform_2, window_bounds = array<i64: 1, 128>}, {pipeline_mode = #tpu.pipeline_mode<synchronous>, transform_indices = @transform_3, window_bounds = array<i64: 128, 128>}, {pipeline_mode = #tpu.pipeline_mode<synchronous>, transform_indices = @transform_4, window_bounds = array<i64: 1, 128>}, {transform_indices = @transform_5, window_bounds = array<i64: 8, 128>}]} {
    %c0 = arith.constant 0 : index
    %c0_0 = arith.constant 0 : index
    %0 = vector.load %arg1[%c0, %c0_0] : memref<8x128xf32, #tpu.memory_space<vmem>>, vector<8x128xf32>
    %c0_1 = arith.constant 0 : index
    %c0_2 = arith.constant 0 : index
    %1 = vector.load %arg2[%c0_1, %c0_2] : memref<128x128xf32, #tpu.memory_space<vmem>>, vector<128x128xf32>
    %cst = arith.constant dense<0.000000e+00> : vector<8x128xf32>
    %2 = tpu.matmul %0, %1, %cst {dimension_numbers = #tpu.dot_dimension_numbers<[1], [0], [0], [1], [0, 0, 1, 1], [], []>} : vector<8x128xf32>, vector<128x128xf32>, vector<8x128xf32> -> vector<8x128xf32>
    %c0_3 = arith.constant 0 : index
    %c0_4 = arith.constant 0 : index
    %3 = vector.load %arg3[%c0_3, %c0_4] : memref<1x128xf32, #tpu.memory_space<vmem>>, vector<1x128xf32>
    %4 = vector.broadcast %3 : vector<1x128xf32> to vector<8x128xf32>
    %5 = arith.addf %2, %4 : vector<8x128xf32>
    %6 = math.tanh %5 : vector<8x128xf32>
    %c0_5 = arith.constant 0 : index
    %c0_6 = arith.constant 0 : index
    %7 = vector.load %arg4[%c0_5, %c0_6] : memref<128x128xf32, #tpu.memory_space<vmem>>, vector<128x128xf32>
    %cst_7 = arith.constant dense<0.000000e+00> : vector<8x128xf32>
    %8 = tpu.matmul %6, %7, %cst_7 {dimension_numbers = #tpu.dot_dimension_numbers<[1], [0], [0], [1], [0, 0, 1, 1], [], []>} : vector<8x128xf32>, vector<128x128xf32>, vector<8x128xf32> -> vector<8x128xf32>
    %c0_8 = arith.constant 0 : index
    %c0_9 = arith.constant 0 : index
    %9 = vector.load %arg5[%c0_8, %c0_9] : memref<1x128xf32, #tpu.memory_space<vmem>>, vector<1x128xf32>
    %10 = vector.broadcast %9 : vector<1x128xf32> to vector<8x128xf32>
    %11 = arith.addf %8, %10 : vector<8x128xf32>
    %12 = math.tanh %11 : vector<8x128xf32>
    %c0_10 = arith.constant 0 : index
    %c0_11 = arith.constant 0 : index
    %13 = vector.load %arg6[%c0_10, %c0_11] : memref<8x128xf32, #tpu.memory_space<vmem>>, vector<8x128xf32>
    tpu.vector_store %arg6[%c0_10, %c0_11], %12 {strides = array<i32>} : memref<8x128xf32, #tpu.memory_space<vmem>>, vector<8x128xf32>,
    return
  }
  func.func @transform_0(%arg0: i32) -> (i32, i32) {
    %c0_i32 = arith.constant 0 : i32
    %c0_i32_0 = arith.constant 0 : i32
    return %arg0, %c0_i32 : i32, i32
  }
  func.func @transform_1(%arg0: i32) -> (i32, i32) {
    %c0_i32 = arith.constant 0 : i32
    %c0_i32_0 = arith.constant 0 : i32
    %c0_i32_1 = arith.constant 0 : i32
    return %c0_i32, %c0_i32_0 : i32, i32
  }
  func.func @transform_2(%arg0: i32) -> (i32, i32) {
    %c0_i32 = arith.constant 0 : i32
    %c0_i32_0 = arith.constant 0 : i32
    %c0_i32_1 = arith.constant 0 : i32
    return %c0_i32, %c0_i32_0 : i32, i32
  }
  func.func @transform_3(%arg0: i32) -> (i32, i32) {
    %c0_i32 = arith.constant 0 : i32
    %c0_i32_0 = arith.constant 0 : i32
    %c0_i32_1 = arith.constant 0 : i32
    return %c0_i32, %c0_i32_0 : i32, i32
  }
  func.func @transform_4(%arg0: i32) -> (i32, i32) {
    %c0_i32 = arith.constant 0 : i32
    %c0_i32_0 = arith.constant 0 : i32
    %c0_i32_1 = arith.constant 0 : i32
    return %c0_i32, %c0_i32_0 : i32, i32
  }
  func.func @transform_5(%arg0: i32) -> (i32, i32) {
    %c0_i32 = arith.constant 0 : i32
    %c0_i32_0 = arith.constant 0 : i32
    return %arg0, %c0_i32 : i32, i32
  }
}

</mosaic_0001>

<bundles_post_ra>
// kernel: tpu_custom_call.1
= control target key start
LH: loop header
LB: loop body
LE: loop exit
PB: predicated region body
PF: predicated region fallthrough
CT: control target
= control target key end

     0   :  { %10 = vsyncpa [#allocation3], 0  ;;  %s1165_s0 = inlined_call_operand.hbm [shape: f32[16,128], index: 0, kind: input, shape index: {}]   ;;  %s1166_s1 = inlined_call_operand.hbm [shape: f32[128,128], index: 1, kind: input, shape index: {}]   ;;  %s1167_s2 = inlined_call_operand.vmem [shape: f32[1,128], index: 2, kind: input, shape index: {}]   ;;  %s1168_s3 = inlined_call_operand.hbm [shape: f32[128,128], index: 3, kind: input, shape index: {}]   ;;  %s1169_s4 = inlined_call_operand.vmem [shape: f32[1,128], index: 4, kind: input, shape index: {}]   ;;  %s1170_s5 = inlined_call_operand.hbm [shape: f32[16,128], index: 5, kind: output, shape index: {}]  }
   0x1   :  { %12 = vsyncpa [#allocation3 + $0x1], 0 }
   0x2   :  { %13 = vsyncpa [#allocation6], 0 }
   0x3   :  { %14 = vsyncpa [#allocation4], 0 }
   0x4   :  { %16 = vsyncpa [#allocation4 + $0x1], 0  ;;  %s947_s18 = smov 0   ;;  %s949_s19 = smov 0  }
   0x5   :  { %s951_s20 = smov 0   ;;  %s953_s21 = smov 0  }
   0x6 LB: > { %s968_s22 = sadd.s32 4294967295, %s907_s21   ;;  %s562_s23 = sadd.s32 4294967294, %s907_s21   ;;  %s907_s21 = sphi %s953_s21, %s1192_s21   ;;  %s903_s20 = sphi %s951_s20, %s1191_s20   ;;  %s899_s19 = sphi %s949_s19, %s1190_s19   ;;  %s895_s18 = sphi %s947_s18, %s1189_s18  }
   0x7   : > { %p42_p0 = scmp.ne.s32.totalorder %s899_s19, %s895_s18  ;;  %p1171_p1 = scmp.eq.s32.totalorder %s968_s22, 0 }
   0x8   : > { %p156_p3 = scmp.eq.s32.totalorder %s562_s23, 1  ;;  %p563_p5 = scmp.ge.s32.totalorder %s907_s21, 1 }
   0x9   : > { %p977_p4 = por %p1171_p1, %p42_p0  ;;  %p163_p7 = scmp.lt.s32.totalorder %s907_s21, 3 }
   0xa   : > { %p982_p6 = por %p156_p3, %p42_p0  ;;  %s909_s27 = smov [#allocation5]  }
   0xb   : > { %s1175_s24 = scalar_select %p977_p4, 1, 0 }
   0xc   : > { %s1176_s25 = scalar_select %p982_p6, 1, 0 }
   0xd   : > { %p987_p8 = pnand %p563_p5, %p163_p7  ;;  %s175_s28 = sshll.u32 %s909_s27, 4  ;;  %s176_s28 = int_to_ptr.vmem [resolvable:$true] %s175_s28 }
   0xe   : > { %s910_s30 = smov [#allocation7]   ;;  %s770_s7 = scalar_lea.vmem %s176_s28, 2048 }
   0xf   : > { %s1177_s26 = scalar_select %p987_p8, 1, 0 }
  0x10   : > { %p696_p9 = pneg %p987_p8  ;;  %s191_s6 = sshll.u32 %s910_s30, 4  ;;  %s192_s6 = int_to_ptr.vmem [resolvable:$true] %s191_s6 }
  0x11   : > { %p771_p13 = scmp.ne.s32.totalorder %s176_s28, %s770_s7  ;;  %p778_p5 = scmp.lt.s32.totalorder %s176_s28, %s176_s28 }
  0x12   : > { %p996_p11 = pnand %p696_p9, %p1171_p1  ;;  %p779_p7 = scmp.lt.s32.totalorder %s770_s7, %s770_s7 }
  0x14   : > { %p761_p12 = pneg %p996_p11  ;;  %p780_p10 = por %p779_p7, %p778_p5 }
  0x16   : > { %p773_p0 = pnand %p771_p13, %p761_p12 }
  0x18   : > { %p774_p3 = pneg %p773_p0 }
  0x1a   : > { %p781_p9 = pnand %p780_p10, %p774_p3 }
  0x1c   : > { %784 = shalt.err (!%p781_p9)
}
  0x1d   : > { %s911_s8 = smov 128   ;;  %s912_s9 = smov 8  }
  0x1e   : > { %699 = dma.hbm_to_vmem [thread:$0]  (!%p996_p11), %s1166_s1, 2048, %s176_s28, [#allocation6], %s911_s8, %s911_s8, %s912_s9  }
  0x1f   : > { %s796_s12 = scalar_lea.vmem %s192_s6, 2048  ;;  %p804_p2 = scmp.lt.s32.totalorder %s192_s6, %s192_s6 }
  0x20   : > { %p797_p1 = scmp.ne.s32.totalorder %s192_s6, %s796_s12  ;;  %p805_p6 = scmp.lt.s32.totalorder %s796_s12, %s796_s12 }
  0x22   : > { %p799_p13 = pnand %p797_p1, %p761_p12  ;;  %p806_p5 = por %p805_p6, %p804_p2 }
  0x24   : > { %p800_p0 = pneg %p799_p13 }
  0x26   : > { %p807_p10 = pnand %p806_p5, %p800_p0 }
  0x28   : > { %810 = shalt.err (!%p807_p10)
}
  0x29   : > { %702 = dma.hbm_to_vmem [thread:$0]  (!%p996_p11), %s1168_s3, 2048, %s192_s6, [#allocation6], %s911_s8, %s911_s8, %s912_s9  }
  0x2a   : > { %s1019_s15 = sadd.s32 1, %s907_s21   ;;  %s29_s16 = sadd.s32 1, %s903_s20 }
  0x2b   : > { %s26_s17 = ssub.s32 %s907_s21, %s1019_s15  ;;  %p36_p1 = scmp.ne.s32.totalorder %s903_s20, %s899_s19 }
  0x2c   : > { %p27_p2 = scmp.eq.s32.totalorder %s26_s17, 0  ;;  %p37_p6 = scmp.eq.s32.totalorder %s907_s21, 0 }
  0x2d   : > { %p1179_p12 = scmp.eq.s32.totalorder %s968_s22, 1  ;;  %p713_p7 = scmp.lt.s32.totalorder %s907_s21, 2 }
  0x2e   : > { %s1035_s27 = scalar_select %p27_p2, %s903_s20, %s29_s16  }
  0x2f   : > { %p1029_p3 = por %p1179_p12, %p36_p1  ;;  %p38_p9 = por %p37_p6, %p36_p1 }
  0x30   : > { %s208_s28 = sand.u32 1, %s903_s20   ;;  %s568_s30 = sshll.u32 %s907_s21, 7 }
  0x31   : > { %s1180_s23 = scalar_select %p1029_p3, 1, 0 }
  0x32   : > { %s567_s29 = sshll.u32 %s208_s28, 3  ;;  %s1042_s8 = scalar_lea.hbm %s1165_s0, %s568_s30 }
  0x33   : > { %s212_s9 = scalar_lea.vmem [#allocation2], %s567_s29  ;;  %p1044_p11 = pnand %p713_p7, %p38_p9 }
  0x34   : > { %s219_s10 = sshll.u32 %s212_s9, 4  ;;  %s209_s12 = scalar_lea.sflag [#allocation3], %s208_s28  ;;  %s220_s10 = int_to_ptr.vmem [resolvable:$true] %s219_s10 }
  0x35   : > { %s811_s13 = scalar_lea.hbm %s1042_s8, 128  ;;  %p813_p0 = pneg %p1044_p11 }
  0x36   : > { %p812_p13 = scmp.ne.s32.totalorder %s1042_s8, %s811_s13  ;;  %s816_s17 = scalar_lea.hbm %s1165_s0, 256 }
  0x37   : > { %p817_p1 = scmp.lt.s32.totalorder %s1042_s8, %s1165_s0  ;;  %p818_p2 = scmp.lt.s32.totalorder %s816_s17, %s811_s13 }
  0x38   : > { %p814_p5 = pnand %p813_p0, %p812_p13 }
  0x39   : > { %p819_p6 = por %p818_p2, %p817_p1 }
  0x3a   : > { %p815_p10 = pneg %p814_p5 }
  0x3c   : > { %p820_p12 = pnand %p819_p6, %p815_p10 }
  0x3e   : > { %823 = shalt.err (!%p820_p12)
}
  0x3f   : > { %s824_s6 = scalar_lea.vmem %s220_s10, 128  ;;  %s913_s28 = smov [#allocation2]  }
  0x40   : > { %p825_p7 = scmp.ne.s32.totalorder %s220_s10, %s824_s6  ;;  %s829_s7 = sshll.u32 %s913_s28, 4  ;;  %s830_s7 = int_to_ptr.vmem [resolvable:$false] %s829_s7 }
  0x41   : > { %s831_s9 = scalar_lea.vmem %s830_s7, 256  ;;  %p832_p13 = scmp.lt.s32.totalorder %s220_s10, %s830_s7 }
  0x42   : > { %p827_p9 = pnand %p825_p7, %p813_p0  ;;  %p833_p5 = scmp.lt.s32.totalorder %s831_s9, %s824_s6 }
  0x44   : > { %p828_p3 = pneg %p827_p9  ;;  %p834_p4 = por %p833_p5, %p832_p13 }
  0x46   : > { %p835_p8 = pnand %p834_p4, %p828_p3 }
  0x48   : > { %838 = shalt.err (!%p835_p8)
}
  0x49   : > { %706 = dma.hbm_to_vmem [thread:$0]  (!%p1044_p11), %s1042_s8, 128, %s220_s10, %s209_s12  }
  0x4a   : > { %p1182_p10 = scmp.ne.s32.totalorder %s1177_s26, 0 }
  0x4b   : > { %s1065_s13 = sand.u32 (!%p1182_p10), 1, %s899_s19   ;;  %p1183_p4 = scmp.ne.s32.totalorder (!%p1182_p10), %s1175_s24, 0 }
  0x4c   : > { %228 = sbr.rel (%p1182_p10) target bundleno = 550 (0x226), region = 40  ;;  %s570_s14 = sshll.u32 (!%p1182_p10), %s1065_s13, 3 }
  0x4d   : > { %s231_s16 = scalar_lea.sflag (!%p1182_p10), [#allocation3], %s1065_s13  ;;  %s1071_s17 = scalar_lea.vmem (!%p1182_p10), [#allocation2], %s570_s14 }
  0x51   : > { %882 = dma.done.wait (%p1183_p4), %s231_s16, 128  }
  0x52   : > { %884 = vsyncadd (%p1183_p4), %s231_s16, 4294967168  ;;  %p1184_p8 = scmp.eq.s32.totalorder %s968_s22, 0 }
  0x54   : > { %886 = dma.done.wait (%p1184_p8), [#allocation6], 4096   ;;  %p1185_p3 = pmov %p1184_p8 }
  0x55   : > { %v914_v0 = vmov 0.0   ;;  %vm915_vm0 = vmmov 0   ;;  %v285_v1 = vld [vmem:[#allocation5 + $0x78] sm:$0xff]  ;;  %v284_v2 = vld [vmem:[#allocation5 + $0x70] sm:$0xff]  ;;  %v283_v3 = vld [vmem:[#allocation5 + $0x68] sm:$0xff]  ;;  %s577_s11 = sshll.u32 %s968_s22, 7 }
  0x56   : > { %888 = vsyncadd (%p1185_p3), [#allocation6], 4294963200  ;;  %614 = vmatprep.subr.mxu0 %v914_v0  ;;  %646 = vmatprep.mubr.msk.f32.mxu0 %vm915_vm0, %v914_v0  ;;  %v282_v4 = vld [vmem:[#allocation5 + $0x60] sm:$0xff]  ;;  %v379_v5 = vld [vmem:[#allocation7 + $0x78] sm:$0xff]  ;;  %s268_s12 = scalar_lea.vmem [#allocation8], %s570_s14  ;;  %s1128_s28 = scalar_lea.hbm %s1170_s5, %s577_s11 }
  0x57   : > { %649 = vmatprep.subr.mxu1 %v914_v0  ;;  %681 = vmatprep.mubr.msk.f32.mxu1 %vm915_vm0, %v914_v0  ;;  %v281_v6 = vld [vmem:[#allocation5 + $0x58] sm:$0xff]  ;;  %v378_v7 = vld [vmem:[#allocation7 + $0x70] sm:$0xff]  ;;  %v377_v8 = vld [vmem:[#allocation7 + $0x68] sm:$0xff]  ;;  %s473_s30 = sshll.u32 %s268_s12, 4  ;;  %s460_s7 = scalar_lea.sflag [#allocation4], %s1065_s13  ;;  %s474_s30 = int_to_ptr.vmem [resolvable:$true] %s473_s30 }
  0x58   : > { %615 = vmatpush3.msra.mxu0 %v285_v1  ;;  %650 = vmatpush3.msra.mxu1 %v379_v5  ;;  %v280_v9 = vld [vmem:[#allocation5 + $0x50] sm:$0xff]  ;;  %v376_v10 = vld [vmem:[#allocation7 + $0x60] sm:$0xff]  ;;  %v279_v11 = vld [vmem:[#allocation5 + $0x48] sm:$0xff]  ;;  %s839_s9 = scalar_lea.vmem %s474_s30, 128  ;;  %p1186_p0 = scmp.ne.s32.totalorder %s1180_s23, 0 }
  0x59   : > { %616 = vmatprep.subr.mxu0 %v914_v0  ;;  %651 = vmatprep.subr.mxu1 %v914_v0  ;;  %v375_v12 = vld [vmem:[#allocation7 + $0x58] sm:$0xff]  ;;  %v278_v13 = vld [vmem:[#allocation5 + $0x40] sm:$0xff]  ;;  %v374_v14 = vld [vmem:[#allocation7 + $0x50] sm:$0xff]  ;;  %p840_p11 = scmp.ne.s32.totalorder %s474_s30, %s839_s9  ;;  %s916_s16 = smov [#allocation8]  }
  0x5a   : > { %617 = vmatpush3.msra.mxu0 %v284_v2  ;;  %652 = vmatpush3.msra.mxu1 %v378_v7  ;;  %v277_v15 = vld [vmem:[#allocation5 + $0x38] sm:$0xff]  ;;  %v373_v16 = vld [vmem:[#allocation7 + $0x48] sm:$0xff]  ;;  %v276_v17 = vld [vmem:[#allocation5 + $0x30] sm:$0xff] }
  0x5b   : > { %618 = vmatprep.subr.mxu0 %v914_v0  ;;  %653 = vmatprep.subr.mxu1 %v914_v0  ;;  %v275_v18 = vld [vmem:[#allocation5 + $0x28] sm:$0xff]  ;;  %v274_v19 = vld [vmem:[#allocation5 + $0x20] sm:$0xff]  ;;  %v273_v20 = vld [vmem:[#allocation5 + $0x18] sm:$0xff]  ;;  %p841_p1 = pnand %p840_p11, %p1186_p0 }
  0x5c   : > { %619 = vmatpush3.msra.mxu0 %v283_v3  ;;  %654 = vmatpush3.msra.mxu1 %v377_v8  ;;  %v272_v21 = vld [vmem:[#allocation5 + $0x10] sm:$0xff]  ;;  %v271_v22 = vld [vmem:[#allocation5 + $0x8] sm:$0xff]  ;;  %v270_v23 = vld [vmem:[#allocation5] sm:$0xff] }
  0x5d   : > { %620 = vmatprep.subr.mxu0 %v914_v0  ;;  %655 = vmatprep.subr.mxu1 %v914_v0  ;;  %v269_v24 = vld [vmem:[%s1071_s17] sm:$0xff]  ;;  %v372_v25 = vld [vmem:[#allocation7 + $0x40] sm:$0xff]  ;;  %v369_v28 = vld [vmem:[#allocation7 + $0x28] sm:$0xff]  ;;  %p842_p2 = pneg %p841_p1  ;;  %s843_s17 = sshll.u32 %s916_s16, 4  ;;  %s844_s17 = int_to_ptr.vmem [resolvable:$false] %s843_s17 }
  0x5e   : > { %621 = vmatpush3.msra.mxu0 %v282_v4  ;;  %656 = vmatpush3.msra.mxu1 %v376_v10  ;;  %v371_v26 = vld [vmem:[#allocation7 + $0x38] sm:$0xff]  ;;  %v370_v27 = vld [vmem:[#allocation7 + $0x30] sm:$0xff]  ;;  %v368_v29 = vld [vmem:[#allocation7 + $0x20] sm:$0xff]  ;;  %s845_s22 = scalar_lea.vmem %s844_s17, 256  ;;  %p846_p6 = scmp.lt.s32.totalorder %s474_s30, %s844_s17 }
  0x5f   : > { %622 = vmatprep.subr.mxu0 %v914_v0  ;;  %657 = vmatprep.subr.mxu1 %v914_v0  ;;  %v367_v30 = vld [vmem:[#allocation7 + $0x18] sm:$0xff]  ;;  %v366_v31 = vld [vmem:[#allocation7 + $0x10] sm:$0xff]  ;;  %v365_v32 = vld [vmem:[#allocation7 + $0x8] sm:$0xff]  ;;  %p847_p12 = scmp.lt.s32.totalorder %s845_s22, %s839_s9 }
  0x60   : > { %623 = vmatpush3.msra.mxu0 %v281_v6  ;;  %658 = vmatpush3.msra.mxu1 %v375_v12  ;;  %v364_v33 = vld [vmem:[#allocation7] sm:$0xff]  ;;  %v574_v34 = vld [vmem:[%s1167_s2] ss:$0 sm:$0xff] }
  0x61   : > { %624 = vmatprep.subr.mxu0 %v914_v0  ;;  %659 = vmatprep.subr.mxu1 %v914_v0  ;;  %v575_v39 = vld [vmem:[%s1169_s4] ss:$0 sm:$0xff]  ;;  %p848_p7 = por %p847_p12, %p846_p6 }
  0x62   : > { %625 = vmatpush3.msra.mxu0 %v280_v9  ;;  %660 = vmatpush3.msra.mxu1 %v374_v14 }
  0x63   : > { %626 = vmatprep.subr.mxu0 %v914_v0  ;;  %661 = vmatprep.subr.mxu1 %v914_v0  ;;  %p849_p9 = pnand %p848_p7, %p842_p2 }
  0x64   : > { %627 = vmatpush3.msra.mxu0 %v279_v11  ;;  %662 = vmatpush3.msra.mxu1 %v373_v16 }
  0x65   : > { %628 = vmatprep.subr.mxu0 %v914_v0  ;;  %663 = vmatprep.subr.mxu1 %v914_v0 }
  0x66   : > { %629 = vmatpush3.msra.mxu0 %v278_v13  ;;  %664 = vmatpush3.msra.mxu1 %v372_v25 }
  0x67   : > { %630 = vmatprep.subr.mxu0 %v914_v0  ;;  %665 = vmatprep.subr.mxu1 %v914_v0 }
  0x68   : > { %631 = vmatpush3.msra.mxu0 %v277_v15  ;;  %666 = vmatpush3.msra.mxu1 %v371_v26 }
  0x69   : > { %632 = vmatprep.subr.mxu0 %v914_v0  ;;  %667 = vmatprep.subr.mxu1 %v914_v0 }
  0x6a   : > { %633 = vmatpush3.msra.mxu0 %v276_v17  ;;  %668 = vmatpush3.msra.mxu1 %v370_v27 }
  0x6b   : > { %634 = vmatprep.subr.mxu0 %v914_v0  ;;  %669 = vmatprep.subr.mxu1 %v914_v0 }
  0x6c   : > { %635 = vmatpush3.msra.mxu0 %v275_v18  ;;  %670 = vmatpush3.msra.mxu1 %v369_v28 }
  0x6d   : > { %636 = vmatprep.subr.mxu0 %v914_v0  ;;  %671 = vmatprep.subr.mxu1 %v914_v0 }
  0x6e   : > { %637 = vmatpush3.msra.mxu0 %v274_v19  ;;  %672 = vmatpush3.msra.mxu1 %v368_v29 }
  0x6f   : > { %638 = vmatprep.subr.mxu0 %v914_v0  ;;  %673 = vmatprep.subr.mxu1 %v914_v0 }
  0x70   : > { %639 = vmatpush3.msra.mxu0 %v273_v20  ;;  %674 = vmatpush3.msra.mxu1 %v367_v30 }
  0x71   : > { %640 = vmatprep.subr.mxu0 %v914_v0  ;;  %675 = vmatprep.subr.mxu1 %v914_v0 }
  0x72   : > { %641 = vmatpush3.msra.mxu0 %v272_v21  ;;  %676 = vmatpush3.msra.mxu1 %v366_v31 }
  0x73   : > { %642 = vmatprep.subr.mxu0 %v914_v0  ;;  %677 = vmatprep.subr.mxu1 %v914_v0 }
  0x74   : > { %643 = vmatpush3.msra.mxu0 %v271_v22  ;;  %678 = vmatpush3.msra.mxu1 %v365_v32 }
  0x75   : > { %644 = vmatprep.subr.mxu0 %v914_v0  ;;  %679 = vmatprep.subr.mxu1 %v914_v0 }
  0x76   : > { %645 = vmatpush3.msra.mxu0 %v270_v23  ;;  %680 = vmatpush3.msra.mxu1 %v364_v33 }
  0x77   : > { %647 = vmatmul.mubr.f32.vlgmr.msra.gmra.mxu0 %v269_v24 }
 0x137   : > { %v359_v35 = vpop.f32.mrf.mxu0 }
 0x138   : > { %v360_v36 = vadd.f32 %v574_v34, %v359_v35 }
 0x139   : > { %v648_v37 = vpop.f32.mrf.mxu0 }
 0x13a   : > { %755 = vtanh.f32 %v360_v36 }
 0x147   : > { %v756_v38 = vpop.eup %755 }
 0x148   : > { %682 = vmatmul.mubr.f32.vlgmr.msra.gmra.mxu1 %v756_v38 }
 0x208   : > { %v453_v40 = vpop.f32.mrf.mxu1 }
 0x209   : > { %v454_v41 = vadd.f32 %v575_v39, %v453_v40 }
 0x20a   : > { %v683_v42 = vpop.f32.mrf.mxu1 }
 0x20b   : > { %757 = vtanh.f32 %v454_v41 }
 0x218   : > { %v758_v43 = vpop.eup %757 }
 0x219   : > { %458 = vst [vmem:[%s268_s12] sm:$0xff] %v758_v43 }
 0x21a   : > { %852 = shalt.err (!%p849_p9)
}
 0x21b   : > { %s853_s14 = scalar_lea.hbm %s1128_s28, 128  ;;  %s857_s26 = scalar_lea.hbm %s1170_s5, 256 }
 0x21c   : > { %p854_p13 = scmp.ne.s32.totalorder %s1128_s28, %s853_s14  ;;  %p858_p4 = scmp.lt.s32.totalorder %s1128_s28, %s1170_s5 }
 0x21d   : > { %p859_p8 = scmp.lt.s32.totalorder %s857_s26, %s853_s14 }
 0x21e   : > { %p855_p5 = pnand %p854_p13, %p1186_p0 }
 0x21f   : > { %p860_p3 = por %p859_p8, %p858_p4 }
 0x220   : > { %p856_p10 = pneg %p855_p5 }
 0x222   : > { %p861_p11 = pnand %p860_p3, %p856_p10 }
 0x224   : > { %864 = shalt.err (!%p861_p11)
}
 0x225   : > { %694 = dma.vmem_to_hbm [thread:$0]  (%p1186_p0), %s474_s30, 128, %s1128_s28, %s460_s7  }
 0x226 PF: > { %s485_s11 = sand.u32 1, %s895_s18   ;;  %p1187_p1 = scmp.ne.s32.totalorder %s1176_s25, 0 }
 0x227   : > { %p1188_p2 = scmp.ge.s32.totalorder %s907_s21, 2  ;;  %s486_s12 = scalar_lea.sflag [#allocation4], %s485_s11 }
 0x229   : > { %p708_p6 = pnand %p1188_p2, %p1187_p1 }
 0x22b   : > { %p709_p12 = pneg %p708_p6 }
 0x22d   : > { %890 = dma.done.wait (%p709_p12), %s486_s12, 128  }
 0x22e   : > { %892 = vsyncadd (%p709_p12), %s486_s12, 4294967168  ;;  %p19_p7 = scmp.ge.s32.totalorder %s1019_s15, 4   ;;  %s1189_s18 = smov %s899_s19 }
 0x22f   : > { %s1190_s19 = smov %s903_s20  ;;  %s1191_s20 = smov %s1035_s27 }
 0x230   : > { %s1192_s21 = smov %s1019_s15  ;;  %21 = sbr.rel (!%p19_p7) target bundleno = 6 (0x6), region = 93 }
 0x235   :  { %491 = vsyncpa [#allocation3], 1 }
 0x236   :  { %493 = vsyncpa [#allocation3 + $0x1], 1 }
 0x237   :  { %494 = vsyncpa [#allocation6], 1 }
 0x238   :  { %495 = vsyncpa [#allocation4], 1 }
 0x239   :  { %497 = vsyncpa [#allocation4 + $0x1], 1 }

// kernel: tpu_custom_call.1
= control target key start
LH: loop header
LB: loop body
LE: loop exit
PB: predicated region body
PF: predicated region fallthrough
CT: control target
= control target key end

     0   :  { %10 = vsyncpa [#allocation3], 0  ;;  %s1165_s0 = inlined_call_operand.hbm [shape: f32[16,128], index: 0, kind: input, shape index: {}]   ;;  %s1166_s1 = inlined_call_operand.hbm [shape: f32[128,128], index: 1, kind: input, shape index: {}]   ;;  %s1167_s2 = inlined_call_operand.vmem [shape: f32[1,128], index: 2, kind: input, shape index: {}]   ;;  %s1168_s3 = inlined_call_operand.hbm [shape: f32[128,128], index: 3, kind: input, shape index: {}]   ;;  %s1169_s4 = inlined_call_operand.vmem [shape: f32[1,128], index: 4, kind: input, shape index: {}]   ;;  %s1170_s5 = inlined_call_operand.hbm [shape: f32[16,128], index: 5, kind: output, shape index: {}]  }
   0x1   :  { %12 = vsyncpa [#allocation3 + $0x1], 0 }
   0x2   :  { %13 = vsyncpa [#allocation6], 0 }
   0x3   :  { %14 = vsyncpa [#allocation4], 0 }
   0x4   :  { %16 = vsyncpa [#allocation4 + $0x1], 0  ;;  %s947_s18 = smov 0   ;;  %s949_s19 = smov 0  }
   0x5   :  { %s951_s20 = smov 0   ;;  %s953_s21 = smov 0  }
   0x6 LB: > { %s968_s22 = sadd.s32 4294967295, %s907_s21   ;;  %s562_s23 = sadd.s32 4294967294, %s907_s21   ;;  %s907_s21 = sphi %s953_s21, %s1192_s21   ;;  %s903_s20 = sphi %s951_s20, %s1191_s20   ;;  %s899_s19 = sphi %s949_s19, %s1190_s19   ;;  %s895_s18 = sphi %s947_s18, %s1189_s18  }
   0x7   : > { %p42_p0 = scmp.ne.s32.totalorder %s899_s19, %s895_s18  ;;  %p1171_p1 = scmp.eq.s32.totalorder %s968_s22, 0 }
   0x8   : > { %p156_p3 = scmp.eq.s32.totalorder %s562_s23, 1  ;;  %p563_p5 = scmp.ge.s32.totalorder %s907_s21, 1 }
   0x9   : > { %p977_p4 = por %p1171_p1, %p42_p0  ;;  %p163_p7 = scmp.lt.s32.totalorder %s907_s21, 3 }
   0xa   : > { %p982_p6 = por %p156_p3, %p42_p0  ;;  %s909_s27 = smov [#allocation5]  }
   0xb   : > { %s1175_s24 = scalar_select %p977_p4, 1, 0 }
   0xc   : > { %s1176_s25 = scalar_select %p982_p6, 1, 0 }
   0xd   : > { %p987_p8 = pnand %p563_p5, %p163_p7  ;;  %s175_s28 = sshll.u32 %s909_s27, 4  ;;  %s176_s28 = int_to_ptr.vmem [resolvable:$true] %s175_s28 }
   0xe   : > { %s910_s30 = smov [#allocation7]   ;;  %s770_s7 = scalar_lea.vmem %s176_s28, 2048 }
   0xf   : > { %s1177_s26 = scalar_select %p987_p8, 1, 0 }
  0x10   : > { %p696_p9 = pneg %p987_p8  ;;  %s191_s6 = sshll.u32 %s910_s30, 4  ;;  %s192_s6 = int_to_ptr.vmem [resolvable:$true] %s191_s6 }
  0x11   : > { %p771_p13 = scmp.ne.s32.totalorder %s176_s28, %s770_s7  ;;  %p778_p5 = scmp.lt.s32.totalorder %s176_s28, %s176_s28 }
  0x12   : > { %p996_p11 = pnand %p696_p9, %p1171_p1  ;;  %p779_p7 = scmp.lt.s32.totalorder %s770_s7, %s770_s7 }
  0x14   : > { %p761_p12 = pneg %p996_p11  ;;  %p780_p10 = por %p779_p7, %p778_p5 }
  0x16   : > { %p773_p0 = pnand %p771_p13, %p761_p12 }
  0x18   : > { %p774_p3 = pneg %p773_p0 }
  0x1a   : > { %p781_p9 = pnand %p780_p10, %p774_p3 }
  0x1c   : > { %784 = shalt.err (!%p781_p9)
}
  0x1d   : > { %s911_s8 = smov 128   ;;  %s912_s9 = smov 8  }
  0x1e   : > { %699 = dma.hbm_to_vmem [thread:$0]  (!%p996_p11), %s1166_s1, 2048, %s176_s28, [#allocation6], %s911_s8, %s911_s8, %s912_s9  }
  0x1f   : > { %s796_s12 = scalar_lea.vmem %s192_s6, 2048  ;;  %p804_p2 = scmp.lt.s32.totalorder %s192_s6, %s192_s6 }
  0x20   : > { %p797_p1 = scmp.ne.s32.totalorder %s192_s6, %s796_s12  ;;  %p805_p6 = scmp.lt.s32.totalorder %s796_s12, %s796_s12 }
  0x22   : > { %p799_p13 = pnand %p797_p1, %p761_p12  ;;  %p806_p5 = por %p805_p6, %p804_p2 }
  0x24   : > { %p800_p0 = pneg %p799_p13 }
  0x26   : > { %p807_p10 = pnand %p806_p5, %p800_p0 }
  0x28   : > { %810 = shalt.err (!%p807_p10)
}
  0x29   : > { %702 = dma.hbm_to_vmem [thread:$0]  (!%p996_p11), %s1168_s3, 2048, %s192_s6, [#allocation6], %s911_s8, %s911_s8, %s912_s9  }
  0x2a   : > { %s1019_s15 = sadd.s32 1, %s907_s21   ;;  %s29_s16 = sadd.s32 1, %s903_s20 }
  0x2b   : > { %s26_s17 = ssub.s32 %s907_s21, %s1019_s15  ;;  %p36_p1 = scmp.ne.s32.totalorder %s903_s20, %s899_s19 }
  0x2c   : > { %p27_p2 = scmp.eq.s32.totalorder %s26_s17, 0  ;;  %p37_p6 = scmp.eq.s32.totalorder %s907_s21, 0 }
  0x2d   : > { %p1179_p12 = scmp.eq.s32.totalorder %s968_s22, 1  ;;  %p713_p7 = scmp.lt.s32.totalorder %s907_s21, 2 }
  0x2e   : > { %s1035_s27 = scalar_select %p27_p2, %s903_s20, %s29_s16  }
  0x2f   : > { %p1029_p3 = por %p1179_p12, %p36_p1  ;;  %p38_p9 = por %p37_p6, %p36_p1 }
  0x30   : > { %s208_s28 = sand.u32 1, %s903_s20   ;;  %s568_s30 = sshll.u32 %s907_s21, 7 }
  0x31   : > { %s1180_s23 = scalar_select %p1029_p3, 1, 0 }
  0x32   : > { %s567_s29 = sshll.u32 %s208_s28, 3  ;;  %s1042_s8 = scalar_lea.hbm %s1165_s0, %s568_s30 }
  0x33   : > { %s212_s9 = scalar_lea.vmem [#allocation2], %s567_s29  ;;  %p1044_p11 = pnand %p713_p7, %p38_p9 }
  0x34   : > { %s219_s10 = sshll.u32 %s212_s9, 4  ;;  %s209_s12 = scalar_lea.sflag [#allocation3], %s208_s28  ;;  %s220_s10 = int_to_ptr.vmem [resolvable:$true] %s219_s10 }
  0x35   : > { %s811_s13 = scalar_lea.hbm %s1042_s8, 128  ;;  %p813_p0 = pneg %p1044_p11 }
  0x36   : > { %p812_p13 = scmp.ne.s32.totalorder %s1042_s8, %s811_s13  ;;  %s816_s17 = scalar_lea.hbm %s1165_s0, 256 }
  0x37   : > { %p817_p1 = scmp.lt.s32.totalorder %s1042_s8, %s1165_s0  ;;  %p818_p2 = scmp.lt.s32.totalorder %s816_s17, %s811_s13 }
  0x38   : > { %p814_p5 = pnand %p813_p0, %p812_p13 }
  0x39   : > { %p819_p6 = por %p818_p2, %p817_p1 }
  0x3a   : > { %p815_p10 = pneg %p814_p5 }
  0x3c   : > { %p820_p12 = pnand %p819_p6, %p815_p10 }
  0x3e   : > { %823 = shalt.err (!%p820_p12)
}
  0x3f   : > { %s824_s6 = scalar_lea.vmem %s220_s10, 128  ;;  %s913_s28 = smov [#allocation2]  }
  0x40   : > { %p825_p7 = scmp.ne.s32.totalorder %s220_s10, %s824_s6  ;;  %s829_s7 = sshll.u32 %s913_s28, 4  ;;  %s830_s7 = int_to_ptr.vmem [resolvable:$false] %s829_s7 }
  0x41   : > { %s831_s9 = scalar_lea.vmem %s830_s7, 256  ;;  %p832_p13 = scmp.lt.s32.totalorder %s220_s10, %s830_s7 }
  0x42   : > { %p827_p9 = pnand %p825_p7, %p813_p0  ;;  %p833_p5 = scmp.lt.s32.totalorder %s831_s9, %s824_s6 }
  0x44   : > { %p828_p3 = pneg %p827_p9  ;;  %p834_p4 = por %p833_p5, %p832_p13 }
  0x46   : > { %p835_p8 = pnand %p834_p4, %p828_p3 }
  0x48   : > { %838 = shalt.err (!%p835_p8)
}
  0x49   : > { %706 = dma.hbm_to_vmem [thread:$0]  (!%p1044_p11), %s1042_s8, 128, %s220_s10, %s209_s12  }
  0x4a   : > { %p1182_p10 = scmp.ne.s32.totalorder %s1177_s26, 0 }
  0x4b   : > { %s1065_s13 = sand.u32 (!%p1182_p10), 1, %s899_s19   ;;  %p1183_p4 = scmp.ne.s32.totalorder (!%p1182_p10), %s1175_s24, 0 }
  0x4c   : > { %228 = sbr.rel (%p1182_p10) target bundleno = 550 (0x226), region = 40  ;;  %s570_s14 = sshll.u32 (!%p1182_p10), %s1065_s13, 3 }
  0x4d   : > { %s231_s16 = scalar_lea.sflag (!%p1182_p10), [#allocation3], %s1065_s13  ;;  %s1071_s17 = scalar_lea.vmem (!%p1182_p10), [#allocation2], %s570_s14 }
  0x51   : > { %882 = dma.done.wait (%p1183_p4), %s231_s16, 128  }
  0x52   : > { %884 = vsyncadd (%p1183_p4), %s231_s16, 4294967168  ;;  %p1184_p8 = scmp.eq.s32.totalorder %s968_s22, 0 }
  0x54   : > { %886 = dma.done.wait (%p1184_p8), [#allocation6], 4096   ;;  %p1185_p3 = pmov %p1184_p8 }
  0x55   : > { %v914_v0 = vmov 0.0   ;;  %vm915_vm0 = vmmov 0   ;;  %v285_v1 = vld [vmem:[#allocation5 + $0x78] sm:$0xff]  ;;  %v284_v2 = vld [vmem:[#allocation5 + $0x70] sm:$0xff]  ;;  %v283_v3 = vld [vmem:[#allocation5 + $0x68] sm:$0xff]  ;;  %s577_s11 = sshll.u32 %s968_s22, 7 }
  0x56   : > { %888 = vsyncadd (%p1185_p3), [#allocation6], 4294963200  ;;  %614 = vmatprep.subr.mxu0 %v914_v0  ;;  %646 = vmatprep.mubr.msk.f32.mxu0 %vm915_vm0, %v914_v0  ;;  %v282_v4 = vld [vmem:[#allocation5 + $0x60] sm:$0xff]  ;;  %v379_v5 = vld [vmem:[#allocation7 + $0x78] sm:$0xff]  ;;  %s268_s12 = scalar_lea.vmem [#allocation8], %s570_s14  ;;  %s1128_s28 = scalar_lea.hbm %s1170_s5, %s577_s11 }
  0x57   : > { %649 = vmatprep.subr.mxu1 %v914_v0  ;;  %681 = vmatprep.mubr.msk.f32.mxu1 %vm915_vm0, %v914_v0  ;;  %v281_v6 = vld [vmem:[#allocation5 + $0x58] sm:$0xff]  ;;  %v378_v7 = vld [vmem:[#allocation7 + $0x70] sm:$0xff]  ;;  %v377_v8 = vld [vmem:[#allocation7 + $0x68] sm:$0xff]  ;;  %s473_s30 = sshll.u32 %s268_s12, 4  ;;  %s460_s7 = scalar_lea.sflag [#allocation4], %s1065_s13  ;;  %s474_s30 = int_to_ptr.vmem [resolvable:$true] %s473_s30 }
  0x58   : > { %615 = vmatpush3.msra.mxu0 %v285_v1  ;;  %650 = vmatpush3.msra.mxu1 %v379_v5  ;;  %v280_v9 = vld [vmem:[#allocation5 + $0x50] sm:$0xff]  ;;  %v376_v10 = vld [vmem:[#allocation7 + $0x60] sm:$0xff]  ;;  %v279_v11 = vld [vmem:[#allocation5 + $0x48] sm:$0xff]  ;;  %s839_s9 = scalar_lea.vmem %s474_s30, 128  ;;  %p1186_p0 = scmp.ne.s32.totalorder %s1180_s23, 0 }
  0x59   : > { %616 = vmatprep.subr.mxu0 %v914_v0  ;;  %651 = vmatprep.subr.mxu1 %v914_v0  ;;  %v375_v12 = vld [vmem:[#allocation7 + $0x58] sm:$0xff]  ;;  %v278_v13 = vld [vmem:[#allocation5 + $0x40] sm:$0xff]  ;;  %v374_v14 = vld [vmem:[#allocation7 + $0x50] sm:$0xff]  ;;  %p840_p11 = scmp.ne.s32.totalorder %s474_s30, %s839_s9  ;;  %s916_s16 = smov [#allocation8]  }
  0x5a   : > { %617 = vmatpush3.msra.mxu0 %v284_v2  ;;  %652 = vmatpush3.msra.mxu1 %v378_v7  ;;  %v277_v15 = vld [vmem:[#allocation5 + $0x38] sm:$0xff]  ;;  %v373_v16 = vld [vmem:[#allocation7 + $0x48] sm:$0xff]  ;;  %v276_v17 = vld [vmem:[#allocation5 + $0x30] sm:$0xff] }
  0x5b   : > { %618 = vmatprep.subr.mxu0 %v914_v0  ;;  %653 = vmatprep.subr.mxu1 %v914_v0  ;;  %v275_v18 = vld [vmem:[#allocation5 + $0x28] sm:$0xff]  ;;  %v274_v19 = vld [vmem:[#allocation5 + $0x20] sm:$0xff]  ;;  %v273_v20 = vld [vmem:[#allocation5 + $0x18] sm:$0xff]  ;;  %p841_p1 = pnand %p840_p11, %p1186_p0 }
  0x5c   : > { %619 = vmatpush3.msra.mxu0 %v283_v3  ;;  %654 = vmatpush3.msra.mxu1 %v377_v8  ;;  %v272_v21 = vld [vmem:[#allocation5 + $0x10] sm:$0xff]  ;;  %v271_v22 = vld [vmem:[#allocation5 + $0x8] sm:$0xff]  ;;  %v270_v23 = vld [vmem:[#allocation5] sm:$0xff] }
  0x5d   : > { %620 = vmatprep.subr.mxu0 %v914_v0  ;;  %655 = vmatprep.subr.mxu1 %v914_v0  ;;  %v269_v24 = vld [vmem:[%s1071_s17] sm:$0xff]  ;;  %v372_v25 = vld [vmem:[#allocation7 + $0x40] sm:$0xff]  ;;  %v369_v28 = vld [vmem:[#allocation7 + $0x28] sm:$0xff]  ;;  %p842_p2 = pneg %p841_p1  ;;  %s843_s17 = sshll.u32 %s916_s16, 4  ;;  %s844_s17 = int_to_ptr.vmem [resolvable:$false] %s843_s17 }
  0x5e   : > { %621 = vmatpush3.msra.mxu0 %v282_v4  ;;  %656 = vmatpush3.msra.mxu1 %v376_v10  ;;  %v371_v26 = vld [vmem:[#allocation7 + $0x38] sm:$0xff]  ;;  %v370_v27 = vld [vmem:[#allocation7 + $0x30] sm:$0xff]  ;;  %v368_v29 = vld [vmem:[#allocation7 + $0x20] sm:$0xff]  ;;  %s845_s22 = scalar_lea.vmem %s844_s17, 256  ;;  %p846_p6 = scmp.lt.s32.totalorder %s474_s30, %s844_s17 }
  0x5f   : > { %622 = vmatprep.subr.mxu0 %v914_v0  ;;  %657 = vmatprep.subr.mxu1 %v914_v0  ;;  %v367_v30 = vld [vmem:[#allocation7 + $0x18] sm:$0xff]  ;;  %v366_v31 = vld [vmem:[#allocation7 + $0x10] sm:$0xff]  ;;  %v365_v32 = vld [vmem:[#allocation7 + $0x8] sm:$0xff]  ;;  %p847_p12 = scmp.lt.s32.totalorder %s845_s22, %s839_s9 }
  0x60   : > { %623 = vmatpush3.msra.mxu0 %v281_v6  ;;  %658 = vmatpush3.msra.mxu1 %v375_v12  ;;  %v364_v33 = vld [vmem:[#allocation7] sm:$0xff]  ;;  %v574_v34 = vld [vmem:[%s1167_s2] ss:$0 sm:$0xff] }
  0x61   : > { %624 = vmatprep.subr.mxu0 %v914_v0  ;;  %659 = vmatprep.subr.mxu1 %v914_v0  ;;  %v575_v39 = vld [vmem:[%s1169_s4] ss:$0 sm:$0xff]  ;;  %p848_p7 = por %p847_p12, %p846_p6 }
  0x62   : > { %625 = vmatpush3.msra.mxu0 %v280_v9  ;;  %660 = vmatpush3.msra.mxu1 %v374_v14 }
  0x63   : > { %626 = vmatprep.subr.mxu0 %v914_v0  ;;  %661 = vmatprep.subr.mxu1 %v914_v0  ;;  %p849_p9 = pnand %p848_p7, %p842_p2 }
  0x64   : > { %627 = vmatpush3.msra.mxu0 %v279_v11  ;;  %662 = vmatpush3.msra.mxu1 %v373_v16 }
  0x65   : > { %628 = vmatprep.subr.mxu0 %v914_v0  ;;  %663 = vmatprep.subr.mxu1 %v914_v0 }
  0x66   : > { %629 = vmatpush3.msra.mxu0 %v278_v13  ;;  %664 = vmatpush3.msra.mxu1 %v372_v25 }
  0x67   : > { %630 = vmatprep.subr.mxu0 %v914_v0  ;;  %665 = vmatprep.subr.mxu1 %v914_v0 }
  0x68   : > { %631 = vmatpush3.msra.mxu0 %v277_v15  ;;  %666 = vmatpush3.msra.mxu1 %v371_v26 }
  0x69   : > { %632 = vmatprep.subr.mxu0 %v914_v0  ;;  %667 = vmatprep.subr.mxu1 %v914_v0 }
  0x6a   : > { %633 = vmatpush3.msra.mxu0 %v276_v17  ;;  %668 = vmatpush3.msra.mxu1 %v370_v27 }
  0x6b   : > { %634 = vmatprep.subr.mxu0 %v914_v0  ;;  %669 = vmatprep.subr.mxu1 %v914_v0 }
  0x6c   : > { %635 = vmatpush3.msra.mxu0 %v275_v18  ;;  %670 = vmatpush3.msra.mxu1 %v369_v28 }
  0x6d   : > { %636 = vmatprep.subr.mxu0 %v914_v0  ;;  %671 = vmatprep.subr.mxu1 %v914_v0 }
  0x6e   : > { %637 = vmatpush3.msra.mxu0 %v274_v19  ;;  %672 = vmatpush3.msra.mxu1 %v368_v29 }
  0x6f   : > { %638 = vmatprep.subr.mxu0 %v914_v0  ;;  %673 = vmatprep.subr.mxu1 %v914_v0 }
  0x70   : > { %639 = vmatpush3.msra.mxu0 %v273_v20  ;;  %674 = vmatpush3.msra.mxu1 %v367_v30 }
  0x71   : > { %640 = vmatprep.subr.mxu0 %v914_v0  ;;  %675 = vmatprep.subr.mxu1 %v914_v0 }
  0x72   : > { %641 = vmatpush3.msra.mxu0 %v272_v21  ;;  %676 = vmatpush3.msra.mxu1 %v366_v31 }
  0x73   : > { %642 = vmatprep.subr.mxu0 %v914_v0  ;;  %677 = vmatprep.subr.mxu1 %v914_v0 }
  0x74   : > { %643 = vmatpush3.msra.mxu0 %v271_v22  ;;  %678 = vmatpush3.msra.mxu1 %v365_v32 }
  0x75   : > { %644 = vmatprep.subr.mxu0 %v914_v0  ;;  %679 = vmatprep.subr.mxu1 %v914_v0 }
  0x76   : > { %645 = vmatpush3.msra.mxu0 %v270_v23  ;;  %680 = vmatpush3.msra.mxu1 %v364_v33 }
  0x77   : > { %647 = vmatmul.mubr.f32.vlgmr.msra.gmra.mxu0 %v269_v24 }
 0x137   : > { %v359_v35 = vpop.f32.mrf.mxu0 }
 0x138   : > { %v360_v36 = vadd.f32 %v574_v34, %v359_v35 }
 0x139   : > { %v648_v37 = vpop.f32.mrf.mxu0 }
 0x13a   : > { %755 = vtanh.f32 %v360_v36 }
 0x147   : > { %v756_v38 = vpop.eup %755 }
 0x148   : > { %682 = vmatmul.mubr.f32.vlgmr.msra.gmra.mxu1 %v756_v38 }
 0x208   : > { %v453_v40 = vpop.f32.mrf.mxu1 }
 0x209   : > { %v454_v41 = vadd.f32 %v575_v39, %v453_v40 }
 0x20a   : > { %v683_v42 = vpop.f32.mrf.mxu1 }
 0x20b   : > { %757 = vtanh.f32 %v454_v41 }
 0x218   : > { %v758_v43 = vpop.eup %757 }
 0x219   : > { %458 = vst [vmem:[%s268_s12] sm:$0xff] %v758_v43 }
 0x21a   : > { %852 = shalt.err (!%p849_p9)
}
 0x21b   : > { %s853_s14 = scalar_lea.hbm %s1128_s28, 128  ;;  %s857_s26 = scalar_lea.hbm %s1170_s5, 256 }
 0x21c   : > { %p854_p13 = scmp.ne.s32.totalorder %s1128_s28, %s853_s14  ;;  %p858_p4 = scmp.lt.s32.totalorder %s1128_s28, %s1170_s5 }
 0x21d   : > { %p859_p8 = scmp.lt.s32.totalorder %s857_s26, %s853_s14 }
 0x21e   : > { %p855_p5 = pnand %p854_p13, %p1186_p0 }
 0x21f   : > { %p860_p3 = por %p859_p8, %p858_p4 }
 0x220   : > { %p856_p10 = pneg %p855_p5 }
 0x222   : > { %p861_p11 = pnand %p860_p3, %p856_p10 }
 0x224   : > { %864 = shalt.err (!%p861_p11)
}
 0x225   : > { %694 = dma.vmem_to_hbm [thread:$0]  (%p1186_p0), %s474_s30, 128, %s1128_s28, %s460_s7  }
 0x226 PF: > { %s485_s11 = sand.u32 1, %s895_s18   ;;  %p1187_p1 = scmp.ne.s32.totalorder %s1176_s25, 0 }
 0x227   : > { %p1188_p2 = scmp.ge.s32.totalorder %s907_s21, 2  ;;  %s486_s12 = scalar_lea.sflag [#allocation4], %s485_s11 }
 0x229   : > { %p708_p6 = pnand %p1188_p2, %p1187_p1 }
 0x22b   : > { %p709_p12 = pneg %p708_p6 }
 0x22d   : > { %890 = dma.done.wait (%p709_p12), %s486_s12, 128  }
 0x22e   : > { %892 = vsyncadd (%p709_p12), %s486_s12, 4294967168  ;;  %p19_p7 = scmp.ge.s32.totalorder %s1019_s15, 4   ;;  %s1189_s18 = smov %s899_s19 }
 0x22f   : > { %s1190_s19 = smov %s903_s20  ;;  %s1191_s20 = smov %s1035_s27 }
 0x230   : > { %s1192_s21 = smov %s1019_s15  ;;  %21 = sbr.rel (!%p19_p7) target bundleno = 6 (0x6), region = 93 }
 0x235   :  { %491 = vsyncpa [#allocation3], 1 }
 0x236   :  { %493 = vsyncpa [#allocation3 + $0x1], 1 }
 0x237   :  { %494 = vsyncpa [#allocation6], 1 }
 0x238   :  { %495 = vsyncpa [#allocation4], 1 }
 0x239   :  { %497 = vsyncpa [#allocation4 + $0x1], 1 }

</bundles_post_ra>
